<compile_context>
chip_gen: v6e
topology: v6e:2x2x1
jax: 0.10.0
libtpu: 0.0.40
codegen_flags: <defaults>
</compile_context>

<pallas_src>
import functools
import math

import jax
import jax.numpy as jnp
from jax.experimental import pallas as pl
from jax.experimental.pallas import tpu as pltpu

LANE = 128
ROW_ALIGN = 16  # bf16 packs 16 rows per vreg


def _round_up(x, m):
    return ((x + m - 1) // m) * m


def _mlp_kernel(x_ref, w0_ref, b0_ref, w_ref, b_ref, out_ref):
    """Full MLP forward for one batch tile.

    x_ref:   (TB, in_dim)       f32  (un-padded input; layer-0 contraction K = in_dim)
    w0_ref:  (in_dim, P)        bf16 (layer-0 weight, only output lanes are padded)
    b0_ref:  (1, P)             f32
    w_ref:   (L-1, P, P)        bf16 (remaining hidden layers + output layer)
    b_ref:   (L-1, 1, P)        f32
    out_ref: (TB, output_dims)  f32  (narrow output: only true columns hit HBM)
    """
    n_rest = w_ref.shape[0]

    # Layer 0: cast LHS to bf16 on the fly, MXU matmul with f32 accumulation,
    # f32 bias + ReLU.  K = in_dim, so no zero-padded contraction lanes.
    h = (
        jnp.dot(x_ref[...].astype(w0_ref.dtype), w0_ref[...],
                preferred_element_type=jnp.float32)
        + b0_ref[...]
    )
    h = jnp.maximum(h, 0.0)

    # Remaining hidden layers (unrolled at trace time; small fixed count).
    for l in range(n_rest - 1):
        h = (
            jnp.dot(h.astype(w_ref.dtype), w_ref[l],
                    preferred_element_type=jnp.float32)
            + b_ref[l]
        )
        h = jnp.maximum(h, 0.0)

    # Output layer: Linear, no activation; write back only the true output columns.
    o = (
        jnp.dot(h.astype(w_ref.dtype), w_ref[n_rest - 1],
                preferred_element_type=jnp.float32)
        + b_ref[n_rest - 1]
    )
    out_ref[...] = o[:, : out_ref.shape[-1]]


def init_feedforward_params(key, input_dims, layer_width, output_dims):
    """Xavier-uniform weights stored as [in, out] and zero biases (matches torch init)."""
    all_units = [input_dims] + list(layer_width) + [output_dims]
    params = []
    for i in range(len(all_units) - 1):
        fan_in, fan_out = all_units[i], all_units[i + 1]
        key, sub = jax.random.split(key)
        bound = math.sqrt(6.0 / (fan_in + fan_out))
        w = jax.random.uniform(sub, (fan_in, fan_out), jnp.float32, -bound, bound)
        b = jnp.zeros((fan_out,), jnp.float32)
        params.append((w, b))
    return params


def pack_params(params, compute_dtype=jnp.bfloat16):
    """Pack parameters for the kernel.

    Layer 0 keeps its true contraction dim (K = input_dims); only its output
    width is zero-padded to the lane-aligned P.  Layers 1..L (remaining hidden
    layers + output layer) are zero-padded to (P, P) and stacked into one slab.
    Zero padding is exact: padded weight rows/cols and biases are zero, and
    ReLU(0) == 0, so padded lanes stay zero through the whole network.
    """
    widths = [w.shape[1] for w, _ in params]        # hidden widths + output width
    P = _round_up(max(widths), LANE)

    w0, b0 = params[0]
    in_dim = w0.shape[0]
    w0_p = jnp.zeros((in_dim, P), jnp.float32).at[:, : w0.shape[1]].set(w0)
    b0_p = jnp.zeros((1, P), jnp.float32).at[:, : b0.shape[-1]].set(b0.reshape(1, -1))

    ws, bs = [], []
    for w, b in params[1:]:
        wp = jnp.zeros((P, P), jnp.float32).at[: w.shape[0], : w.shape[1]].set(w)
        bp = jnp.zeros((1, P), jnp.float32).at[:, : b.shape[-1]].set(b.reshape(1, -1))
        ws.append(wp)
        bs.append(bp)

    return (
        w0_p.astype(compute_dtype),
        b0_p,
        jnp.stack(ws).astype(compute_dtype),
        jnp.stack(bs),
    )


def _choose_batch_tiling(batch, block_batch):
    """Pick (tile_rows, num_tiles).

    16-row aligned tiles (bf16 vreg packing), derived from cdiv(batch, n) so a
    batch just past a tile boundary never doubles the padded work, and >= 2 grid
    steps whenever batch is large enough (v7x: 2 TensorCores; no-op on v5e/v6e).
    """
    n = -(-batch // block_batch)
    if batch >= 2 * ROW_ALIGN:
        n = max(n, 2)
    tb = min(_round_up(-(-batch // n), ROW_ALIGN), _round_up(block_batch, ROW_ALIGN))
    n = -(-batch // tb)
    return tb, n


@functools.partial(jax.jit, static_argnames=("output_dims", "block_batch"))
def feedforward_net(x, w0, b0, w_stack, b_stack, *, output_dims, block_batch=2048):
    """Pallas-backed forward pass.  x: [batch, input_dims] f32."""
    batch, in_dim = x.shape
    n_rest, P, _ = w_stack.shape

    tb, n_tiles = _choose_batch_tiling(batch, block_batch)
    batch_pad = tb * n_tiles

    # Only pad zero ROWS when batch isn't tile-aligned; no lane padding and no
    # dtype cast in the wrapper (the kernel casts to bf16 on the fly).
    x_in = x if batch_pad == batch else jnp.pad(x, ((0, batch_pad - batch), (0, 0)))

    # VMEM budget at tb=2048: x tile 256 KiB + out tile ~1 MiB (double-buffered)
    # + resident params ~110 KiB + f32 intermediates ~1 MiB -> well under the
    # 32 MiB scoped default on every generation (incl. v7x's 64 MiB physical).
    out_pad = pl.pallas_call(
        _mlp_kernel,
        out_shape=jax.ShapeDtypeStruct((batch_pad, output_dims), jnp.float32),
        grid=(n_tiles,),
        in_specs=[
            # Stream raw batch tiles of the activations (last dim == full array dim).
            pl.BlockSpec((tb, in_dim), lambda i: (i, 0)),
            # Parameters: constant index_map -> fetched once, resident across the grid.
            pl.BlockSpec((in_dim, P), lambda i: (0, 0)),
            pl.BlockSpec((1, P), lambda i: (0, 0)),
            pl.BlockSpec((n_rest, P, P), lambda i: (0, 0, 0)),
            pl.BlockSpec((n_rest, 1, P), lambda i: (0, 0, 0)),
        ],
        # Narrow output: only the true output columns hit HBM (4 B/row for dims=1).
        out_specs=pl.BlockSpec((tb, output_dims), lambda i: (i, 0)),
        compiler_params=pltpu.CompilerParams(
            # Independent batch tiles: lets Mosaic shard the grid across the two
            # TensorCores on v7x (no-op on single-TC v5e/v6e).
            dimension_semantics=("parallel",),
        ),
    )(x_in, w0, b0, w_stack, b_stack)

    return out_pad[:batch] if batch_pad != batch else out_pad


def feedforward_net_ref(x, params, compute_dtype=jnp.float32):
    """Pure-JAX reference (matmul operands in compute_dtype, f32 accumulation)."""
    h = x
    for w, b in params[:-1]:
        h = (
            jnp.dot(h.astype(compute_dtype), w.astype(compute_dtype),
                    preferred_element_type=jnp.float32)
            + b
        )
        h = jnp.maximum(h, 0.0)
    w, b = params[-1]
    return (
        jnp.dot(h.astype(compute_dtype), w.astype(compute_dtype),
                preferred_element_type=jnp.float32)
        + b
    )


if __name__ == "__main__":
    key = jax.random.PRNGKey(0)

    # Shapes consistent with the module: input_dims=32, layer_width=[10,10,10], output_dims=1
    input_dims = 32
    layer_width = [10, 10, 10]
    output_dims = 1

    key, pkey = jax.random.split(key)
    params = init_feedforward_params(pkey, input_dims, layer_width, output_dims)
    w0, b0, w_stack, b_stack = pack_params(params, compute_dtype=jnp.bfloat16)

    # Small single-tile case plus a multi-tile case with a ragged remainder
    # (exercises the streamed batch grid and zero-row padding path).
    for batch in (8, 333):
        key, xkey = jax.random.split(key)
        x = jax.random.normal(xkey, (batch, input_dims), jnp.float32)

        out = feedforward_net(x, w0, b0, w_stack, b_stack, output_dims=output_dims)
        out = jax.block_until_ready(out)
        assert out.shape == (batch, output_dims), out.shape

        # Tight check vs a reference with identical bf16-operand / f32-accumulate semantics.
        ref_bf16 = feedforward_net_ref(x, params, compute_dtype=jnp.bfloat16)
        assert jnp.allclose(out, ref_bf16, atol=1e-3, rtol=1e-3), "mismatch vs bf16 reference"

        # Loose sanity check vs the full-f32 reference (difference = bf16 MXU rounding only).
        ref_f32 = feedforward_net_ref(x, params, compute_dtype=jnp.float32)
        assert jnp.allclose(out, ref_f32, atol=5e-2, rtol=5e-2), "mismatch vs f32 reference"

    print("KERNEL_OK")
</pallas_src>

<mosaic_0001>
module attributes {stable_mosaic.version = 11 : i64} {
  func.func @_mlp_kernel(%arg0: i32, %arg1: memref<16x32xf32, #tpu.memory_space<vmem>>, %arg2: memref<32x128xbf16, #tpu.memory_space<vmem>>, %arg3: memref<1x128xf32, #tpu.memory_space<vmem>>, %arg4: memref<3x128x128xbf16, #tpu.memory_space<vmem>>, %arg5: memref<3x1x128xf32, #tpu.memory_space<vmem>>, %arg6: memref<16x1xf32, #tpu.memory_space<vmem>>) attributes {dimension_semantics = [#tpu.dimension_semantics<parallel>], iteration_bounds = array<i64: 1>, scalar_prefetch = 0 : i64, scratch_operands = 0 : i64, tpu.core_type = #tpu.core_type<tc>, window_params = [{transform_indices = @transform_0, window_bounds = array<i64: 16, 32>}, {pipeline_mode = #tpu.pipeline_mode<synchronous>, transform_indices = @transform_1, window_bounds = array<i64: 32, 128>}, {pipeline_mode = #tpu.pipeline_mode<synchronous>, transform_indices = @transform_2, window_bounds = array<i64: 1, 128>}, {pipeline_mode = #tpu.pipeline_mode<synchronous>, transform_indices = @transform_3, window_bounds = array<i64: 3, 128, 128>}, {pipeline_mode = #tpu.pipeline_mode<synchronous>, transform_indices = @transform_4, window_bounds = array<i64: 3, 1, 128>}, {transform_indices = @transform_5, window_bounds = array<i64: 16, 1>}]} {
    %c0 = arith.constant 0 : index
    %c0_0 = arith.constant 0 : index
    %0 = vector.load %arg1[%c0, %c0_0] : memref<16x32xf32, #tpu.memory_space<vmem>>, vector<16x32xf32>
    %1 = arith.truncf %0 : vector<16x32xf32> to vector<16x32xbf16>
    %c0_1 = arith.constant 0 : index
    %c0_2 = arith.constant 0 : index
    %2 = vector.load %arg2[%c0_1, %c0_2] : memref<32x128xbf16, #tpu.memory_space<vmem>>, vector<32x128xbf16>
    %cst = arith.constant dense<0.000000e+00> : vector<16x128xf32>
    %3 = tpu.matmul %1, %2, %cst {dimension_numbers = #tpu.dot_dimension_numbers<[1], [0], [0], [1], [0, 0, 1, 1], [], []>} : vector<16x32xbf16>, vector<32x128xbf16>, vector<16x128xf32> -> vector<16x128xf32>
    %c0_3 = arith.constant 0 : index
    %c0_4 = arith.constant 0 : index
    %4 = vector.load %arg3[%c0_3, %c0_4] : memref<1x128xf32, #tpu.memory_space<vmem>>, vector<1x128xf32>
    %5 = vector.broadcast %4 : vector<1x128xf32> to vector<16x128xf32>
    %6 = arith.addf %3, %5 : vector<16x128xf32>
    %cst_5 = arith.constant 0.000000e+00 : f32
    %7 = vector.broadcast %cst_5 : f32 to vector<16x128xf32>
    %8 = arith.maximumf %6, %7 : vector<16x128xf32>
    %9 = arith.truncf %8 : vector<16x128xf32> to vector<16x128xbf16>
    %c0_6 = arith.constant 0 : index
    %c0_7 = arith.constant 0 : index
    %c0_8 = arith.constant 0 : index
    %10 = vector.load %arg4[%c0_6, %c0_7, %c0_8] : memref<3x128x128xbf16, #tpu.memory_space<vmem>>, vector<1x128x128xbf16>
    %11 = vector.shape_cast %10 : vector<1x128x128xbf16> to vector<128x128xbf16>
    %cst_9 = arith.constant dense<0.000000e+00> : vector<16x128xf32>
    %12 = tpu.matmul %9, %11, %cst_9 {dimension_numbers = #tpu.dot_dimension_numbers<[1], [0], [0], [1], [0, 0, 1, 1], [], []>} : vector<16x128xbf16>, vector<128x128xbf16>, vector<16x128xf32> -> vector<16x128xf32>
    %c0_10 = arith.constant 0 : index
    %c0_11 = arith.constant 0 : index
    %c0_12 = arith.constant 0 : index
    %13 = vector.load %arg5[%c0_10, %c0_11, %c0_12] : memref<3x1x128xf32, #tpu.memory_space<vmem>>, vector<1x1x128xf32>
    %14 = vector.shape_cast %13 : vector<1x1x128xf32> to vector<1x128xf32>
    %15 = vector.broadcast %14 : vector<1x128xf32> to vector<16x128xf32>
    %16 = arith.addf %12, %15 : vector<16x128xf32>
    %cst_13 = arith.constant 0.000000e+00 : f32
    %17 = vector.broadcast %cst_13 : f32 to vector<16x128xf32>
    %18 = arith.maximumf %16, %17 : vector<16x128xf32>
    %19 = arith.truncf %18 : vector<16x128xf32> to vector<16x128xbf16>
    %c1 = arith.constant 1 : index
    %c0_14 = arith.constant 0 : index
    %c0_15 = arith.constant 0 : index
    %20 = vector.load %arg4[%c1, %c0_14, %c0_15] : memref<3x128x128xbf16, #tpu.memory_space<vmem>>, vector<1x128x128xbf16>
    %21 = vector.shape_cast %20 : vector<1x128x128xbf16> to vector<128x128xbf16>
    %cst_16 = arith.constant dense<0.000000e+00> : vector<16x128xf32>
    %22 = tpu.matmul %19, %21, %cst_16 {dimension_numbers = #tpu.dot_dimension_numbers<[1], [0], [0], [1], [0, 0, 1, 1], [], []>} : vector<16x128xbf16>, vector<128x128xbf16>, vector<16x128xf32> -> vector<16x128xf32>
    %c1_17 = arith.constant 1 : index
    %c0_18 = arith.constant 0 : index
    %c0_19 = arith.constant 0 : index
    %23 = vector.load %arg5[%c1_17, %c0_18, %c0_19] : memref<3x1x128xf32, #tpu.memory_space<vmem>>, vector<1x1x128xf32>
    %24 = vector.shape_cast %23 : vector<1x1x128xf32> to vector<1x128xf32>
    %25 = vector.broadcast %24 : vector<1x128xf32> to vector<16x128xf32>
    %26 = arith.addf %22, %25 : vector<16x128xf32>
    %cst_20 = arith.constant 0.000000e+00 : f32
    %27 = vector.broadcast %cst_20 : f32 to vector<16x128xf32>
    %28 = arith.maximumf %26, %27 : vector<16x128xf32>
    %29 = arith.truncf %28 : vector<16x128xf32> to vector<16x128xbf16>
    %c2 = arith.constant 2 : index
    %c0_21 = arith.constant 0 : index
    %c0_22 = arith.constant 0 : index
    %30 = vector.load %arg4[%c2, %c0_21, %c0_22] : memref<3x128x128xbf16, #tpu.memory_space<vmem>>, vector<1x128x128xbf16>
    %31 = vector.shape_cast %30 : vector<1x128x128xbf16> to vector<128x128xbf16>
    %cst_23 = arith.constant dense<0.000000e+00> : vector<16x128xf32>
    %32 = tpu.matmul %29, %31, %cst_23 {dimension_numbers = #tpu.dot_dimension_numbers<[1], [0], [0], [1], [0, 0, 1, 1], [], []>} : vector<16x128xbf16>, vector<128x128xbf16>, vector<16x128xf32> -> vector<16x128xf32>
    %c2_24 = arith.constant 2 : index
    %c0_25 = arith.constant 0 : index
    %c0_26 = arith.constant 0 : index
    %33 = vector.load %arg5[%c2_24, %c0_25, %c0_26] : memref<3x1x128xf32, #tpu.memory_space<vmem>>, vector<1x1x128xf32>
    %34 = vector.shape_cast %33 : vector<1x1x128xf32> to vector<1x128xf32>
    %35 = vector.broadcast %34 : vector<1x128xf32> to vector<16x128xf32>
    %36 = arith.addf %32, %35 : vector<16x128xf32>
    %37 = vector.extract_strided_slice %36 {offsets = [0, 0], sizes = [16, 1], strides = [1, 1]} : vector<16x128xf32> to vector<16x1xf32>
    %c0_27 = arith.constant 0 : index
    %c0_28 = arith.constant 0 : index
    %38 = vector.load %arg6[%c0_27, %c0_28] : memref<16x1xf32, #tpu.memory_space<vmem>>, vector<16x1xf32>
    tpu.vector_store %arg6[%c0_27, %c0_28], %37 {strides = array<i32>} : memref<16x1xf32, #tpu.memory_space<vmem>>, vector<16x1xf32>,
    return
  }
  func.func @transform_0(%arg0: i32) -> (i32, i32) {
    %c0_i32 = arith.constant 0 : i32
    %c0_i32_0 = arith.constant 0 : i32
    return %arg0, %c0_i32 : i32, i32
  }
  func.func @transform_1(%arg0: i32) -> (i32, i32) {
    %c0_i32 = arith.constant 0 : i32
    %c0_i32_0 = arith.constant 0 : i32
    %c0_i32_1 = arith.constant 0 : i32
    return %c0_i32, %c0_i32_0 : i32, i32
  }
  func.func @transform_2(%arg0: i32) -> (i32, i32) {
    %c0_i32 = arith.constant 0 : i32
    %c0_i32_0 = arith.constant 0 : i32
    %c0_i32_1 = arith.constant 0 : i32
    return %c0_i32, %c0_i32_0 : i32, i32
  }
  func.func @transform_3(%arg0: i32) -> (i32, i32, i32) {
    %c0_i32 = arith.constant 0 : i32
    %c0_i32_0 = arith.constant 0 : i32
    %c0_i32_1 = arith.constant 0 : i32
    %c0_i32_2 = arith.constant 0 : i32
    return %c0_i32, %c0_i32_0, %c0_i32_1 : i32, i32, i32
  }
  func.func @transform_4(%arg0: i32) -> (i32, i32, i32) {
    %c0_i32 = arith.constant 0 : i32
    %c0_i32_0 = arith.constant 0 : i32
    %c0_i32_1 = arith.constant 0 : i32
    %c0_i32_2 = arith.constant 0 : i32
    return %c0_i32, %c0_i32_0, %c0_i32_1 : i32, i32, i32
  }
  func.func @transform_5(%arg0: i32) -> (i32, i32) {
    %c0_i32 = arith.constant 0 : i32
    %c0_i32_0 = arith.constant 0 : i32
    return %arg0, %c0_i32 : i32, i32
  }
}

</mosaic_0001>

<bundles_post_ra>
// kernel: feedforward_net.1
= control target key start
LH: loop header
LB: loop body
LE: loop exit
PB: predicated region body
PF: predicated region fallthrough
CT: control target
= control target key end

     0   :  { %10 = vsyncpa [#allocation3], 0  ;;  %s647_s18 = smov [#allocation2]   ;;  %s749_s0 = inlined_call_operand.vmem [shape: f32[16,32], index: 0, kind: input, shape index: {}]   ;;  %s750_s1 = inlined_call_operand.vmem [shape: bf16[32,128], index: 1, kind: input, shape index: {}]   ;;  %s751_s2 = inlined_call_operand.vmem [shape: f32[1,128], index: 2, kind: input, shape index: {}]   ;;  %s752_s3 = inlined_call_operand.hbm [shape: bf16[3,128,128], index: 3, kind: input, shape index: {}]   ;;  %s753_s4 = inlined_call_operand.vmem [shape: f32[3,1,128], index: 4, kind: input, shape index: {}]   ;;  %s754_s5 = inlined_call_operand.vmem [shape: f32[16,1], index: 5, kind: output, shape index: {}]  }
   0x1   :  { %s22_s19 = sshll.u32 %s647_s18, 4  ;;  %s23_s19 = int_to_ptr.vmem [resolvable:$true] %s22_s19 }
   0x2   :  { %s633_s20 = scalar_lea.vmem %s23_s19, 3072  ;;  %p638_p1 = scmp.lt.s32.totalorder %s23_s19, %s23_s19 }
   0x3   :  { %p634_p0 = scmp.ne.s32.totalorder %s23_s19, %s633_s20  ;;  %p639_p2 = scmp.lt.s32.totalorder %s633_s20, %s633_s20 }
   0x5   :  { %p640_p3 = por %p639_p2, %p638_p1 }
   0x7   :  { %p641_p4 = pnand %p640_p3, %p634_p0 }
   0x9   :  { %644 = shalt.err (!%p641_p4)
}
   0xa   :  { %s648_s21 = smov 64   ;;  %s649_s22 = smov 4  }
   0xb   :  { %28 = dma.hbm_to_vmem [thread:$0]  %s752_s3, 3072, %s23_s19, [#allocation3], %s648_s21, %s648_s21, %s649_s22  }
   0xc   :  { %645 = dma.done.wait [#allocation3], 3072  }
   0xd   :  { %646 = vsyncadd [#allocation3], 4294964224  ;;  %v650_v0 = vmov 0.0   ;;  %vm651_vm0 = vmmov 0   ;;  %v599_v1 = vld [vmem:[%s750_s1 + $0x8] sm:$0xff]   ;;  %v600_v2 = vld [vmem:[%s750_s1] sm:$0xff]  }
   0xe   :  { %526 = vmatprep.subr.bf16.mxu0 %v650_v0  ;;  %530 = vmatprep.mubr.msk.bf16.mxu0 %vm651_vm0, %v650_v0  ;;  %v35_v3 = vld [vmem:[%s749_s0] sm:$0xff]  ;;  %v36_v4 = vld [vmem:[%s749_s0 + $0x8] sm:$0xff]  ;;  %v601_v5 = vld [vmem:[#allocation2 + $0x38] sm:$0xff]   ;;  %vm61_vm1 = vcmask 261120   ;;  %vm455_vm2 = vcmask 7168  }
   0xf   :  { %534 = vmatprep.subr.bf16.mxu1 %v650_v0  ;;  %550 = vmatprep.mubr.msk.bf16.mxu1 %vm651_vm0, %v650_v0  ;;  %v37_v6 = vpack.c.bf16 %v36_v4, %v35_v3  ;;  %v602_v7 = vld [vmem:[#allocation2 + $0x30] sm:$0xff]   ;;  %v603_v8 = vld [vmem:[#allocation2 + $0x28] sm:$0xff]   ;;  %v604_v9 = vld [vmem:[#allocation2 + $0x20] sm:$0xff]  }
  0x10   :  { %527 = vmatpush3.bf16.msra.mxu0 %v599_v1  ;;  %535 = vmatpush3.bf16.msra.mxu1 %v601_v5  ;;  %v605_v10 = vld [vmem:[#allocation2 + $0x18] sm:$0xff]   ;;  %v606_v11 = vld [vmem:[#allocation2 + $0x10] sm:$0xff]   ;;  %v607_v12 = vld [vmem:[#allocation2 + $0x8] sm:$0xff]  }
  0x11   :  { %528 = vmatprep.subr.bf16.mxu0 %v650_v0  ;;  %536 = vmatprep.subr.bf16.mxu1 %v650_v0  ;;  %v608_v13 = vld [vmem:[#allocation2] sm:$0xff]   ;;  %v609_v14 = vld [vmem:[#allocation2 + $0x78] sm:$0xff]   ;;  %v610_v15 = vld [vmem:[#allocation2 + $0x70] sm:$0xff]  }
  0x12   :  { %v611_v16 = vld [vmem:[#allocation2 + $0x68] sm:$0xff]   ;;  %v612_v17 = vld [vmem:[#allocation2 + $0x60] sm:$0xff]   ;;  %v613_v18 = vld [vmem:[#allocation2 + $0x58] sm:$0xff]  }
  0x13   :  { %v463_v19 = vld [vmem:[%s751_s2] ss:$0 sm:$0xff]  ;;  %v614_v29 = vld [vmem:[#allocation2 + $0x50] sm:$0xff]   ;;  %v615_v30 = vld [vmem:[#allocation2 + $0x48] sm:$0xff]  }
  0x14   :  { %529 = vmatpush3.bf16.msra.mxu0 %v600_v2  ;;  %537 = vmatpush3.bf16.msra.mxu1 %v602_v7  ;;  %v616_v31 = vld [vmem:[#allocation2 + $0x40] sm:$0xff]   ;;  %v617_v32 = vld [vmem:[#allocation2 + $0xb8] sm:$0xff]   ;;  %v618_v33 = vld [vmem:[#allocation2 + $0xb0] sm:$0xff]  }
  0x15   :  { %554 = vmatprep.subr.bf16.mxu0 %v650_v0  ;;  %538 = vmatprep.subr.bf16.mxu1 %v650_v0  ;;  %v619_v34 = vld [vmem:[#allocation2 + $0xa8] sm:$0xff]   ;;  %v620_v35 = vld [vmem:[#allocation2 + $0xa0] sm:$0xff]   ;;  %v621_v36 = vld [vmem:[#allocation2 + $0x98] sm:$0xff]  }
  0x16   :  { %v467_v37 = vld [vmem:[%s753_s4] ss:$0 sm:$0xff]  ;;  %v622_v47 = vld [vmem:[#allocation2 + $0x90] sm:$0xff]   ;;  %v623_v48 = vld [vmem:[#allocation2 + $0x88] sm:$0xff]  }
  0x17   :  { %531 = vmatmul.mubr.msk.bf16.vlgmr.msra.gmra.mxu0 %vm61_vm1, %v37_v6  ;;  %v624_v49 = vld [vmem:[#allocation2 + $0x80] sm:$0xff]  }
  0x18   :  { %570 = vmatprep.mubr.msk.bf16.mxu0 %vm651_vm0, %v650_v0  ;;  %539 = vmatpush3.bf16.msra.mxu1 %v603_v8  ;;  %v477_v50 = vld [vmem:[%s753_s4 + $0x1] ss:$0 sm:$0xff]  ;;  %v487_v60 = vld [vmem:[%s753_s4 + $0x2] ss:$0 sm:$0xff] }
  0x19   :  { %540 = vmatprep.subr.bf16.mxu1 %v650_v0  ;;  %555 = vmatpush3.bf16.msra.mxu0 %v609_v14 }
  0x1a   :  { %556 = vmatprep.subr.bf16.mxu0 %v650_v0 }
  0x1c   :  { %541 = vmatpush3.bf16.msra.mxu1 %v604_v9 }
  0x1d   :  { %542 = vmatprep.subr.bf16.mxu1 %v650_v0  ;;  %557 = vmatpush3.bf16.msra.mxu0 %v610_v15 }
  0x1e   :  { %558 = vmatprep.subr.bf16.mxu0 %v650_v0 }
  0x20   :  { %543 = vmatpush3.bf16.msra.mxu1 %v605_v10 }
  0x21   :  { %544 = vmatprep.subr.bf16.mxu1 %v650_v0  ;;  %559 = vmatpush3.bf16.msra.mxu0 %v611_v16 }
  0x22   :  { %560 = vmatprep.subr.bf16.mxu0 %v650_v0 }
  0x24   :  { %545 = vmatpush3.bf16.msra.mxu1 %v606_v11 }
  0x25   :  { %546 = vmatprep.subr.bf16.mxu1 %v650_v0  ;;  %561 = vmatpush3.bf16.msra.mxu0 %v612_v17 }
  0x26   :  { %562 = vmatprep.subr.bf16.mxu0 %v650_v0 }
  0x28   :  { %547 = vmatpush3.bf16.msra.mxu1 %v607_v12 }
  0x29   :  { %548 = vmatprep.subr.bf16.mxu1 %v650_v0  ;;  %563 = vmatpush3.bf16.msra.mxu0 %v613_v18 }
  0x2a   :  { %564 = vmatprep.subr.bf16.mxu0 %v650_v0 }
  0x2c   :  { %549 = vmatpush3.bf16.msra.mxu1 %v608_v13 }
  0x2d   :  { %574 = vmatprep.subr.bf16.mxu1 %v650_v0  ;;  %565 = vmatpush3.bf16.msra.mxu0 %v614_v29 }
  0x2e   :  { %566 = vmatprep.subr.bf16.mxu0 %v650_v0 }
  0x31   :  { %567 = vmatpush3.bf16.msra.mxu0 %v615_v30 }
  0x32   :  { %568 = vmatprep.subr.bf16.mxu0 %v650_v0 }
  0x35   :  { %569 = vmatpush3.bf16.msra.mxu0 %v616_v31 }
  0xd7   :  { %v99_v20 = vpop.f32.mrf.mxu0 }
  0xd8   :  { %v100_v22 = vadd.f32 %v463_v19, %v99_v20 }
  0xd9   :  { %v532_v21 = vpop.f32.mrf.mxu0 }
  0xda   :  { %v106_v26 = vmax.f32 %v100_v22, 0.0 }
  0xdb   :  { %v102_v23 = vpop.f32.mrf.mxu0 }
  0xdc   :  { %v103_v24 = vadd.f32 %v463_v19, %v102_v23 }
  0xdd   :  { %v533_v25 = vpop.f32.mrf.mxu0 }
  0xde   :  { %v107_v27 = vmax.f32 %v103_v24, 0.0 }
  0xe0   :  { %v108_v28 = vpack.c.bf16 %v107_v27, %v106_v26 }
  0xe2   :  { %551 = vmatmul.mubr.bf16.vlgmr.msra.gmra.mxu1 %v108_v28 }
  0xe3   :  { %590 = vmatprep.mubr.msk.bf16.mxu1 %vm651_vm0, %v650_v0  ;;  %575 = vmatpush3.bf16.msra.mxu1 %v617_v32 }
  0xe4   :  { %576 = vmatprep.subr.bf16.mxu1 %v650_v0 }
  0xe7   :  { %577 = vmatpush3.bf16.msra.mxu1 %v618_v33 }
  0xe8   :  { %578 = vmatprep.subr.bf16.mxu1 %v650_v0 }
  0xeb   :  { %579 = vmatpush3.bf16.msra.mxu1 %v619_v34 }
  0xec   :  { %580 = vmatprep.subr.bf16.mxu1 %v650_v0 }
  0xef   :  { %581 = vmatpush3.bf16.msra.mxu1 %v620_v35 }
  0xf0   :  { %582 = vmatprep.subr.bf16.mxu1 %v650_v0 }
  0xf3   :  { %583 = vmatpush3.bf16.msra.mxu1 %v621_v36 }
  0xf4   :  { %584 = vmatprep.subr.bf16.mxu1 %v650_v0 }
  0xf7   :  { %585 = vmatpush3.bf16.msra.mxu1 %v622_v47 }
  0xf8   :  { %586 = vmatprep.subr.bf16.mxu1 %v650_v0 }
  0xfb   :  { %587 = vmatpush3.bf16.msra.mxu1 %v623_v48 }
  0xfc   :  { %588 = vmatprep.subr.bf16.mxu1 %v650_v0 }
  0xff   :  { %589 = vmatpush3.bf16.msra.mxu1 %v624_v49 }
 0x1a2   :  { %v214_v38 = vpop.f32.mrf.mxu1 }
 0x1a3   :  { %v215_v40 = vadd.f32 %v467_v37, %v214_v38 }
 0x1a4   :  { %v552_v39 = vpop.f32.mrf.mxu1 }
 0x1a5   :  { %v221_v44 = vmax.f32 %v215_v40, 0.0 }
 0x1a6   :  { %v217_v41 = vpop.f32.mrf.mxu1 }
 0x1a7   :  { %v218_v42 = vadd.f32 %v467_v37, %v217_v41 }
 0x1a8   :  { %v553_v43 = vpop.f32.mrf.mxu1 }
 0x1a9   :  { %v222_v45 = vmax.f32 %v218_v42, 0.0 }
 0x1ab   :  { %v223_v46 = vpack.c.bf16 %v222_v45, %v221_v44 }
 0x1ad   :  { %571 = vmatmul.mubr.bf16.vlgmr.msra.gmra.mxu0 %v223_v46 }
 0x26d   :  { %v331_v51 = vpop.f32.mrf.mxu0 }
 0x26e   :  { %v332_v53 = vadd.f32 %v477_v50, %v331_v51 }
 0x26f   :  { %v572_v52 = vpop.f32.mrf.mxu0 }
 0x270   :  { %v338_v57 = vmax.f32 %v332_v53, 0.0 }
 0x271   :  { %v334_v54 = vpop.f32.mrf.mxu0 }
 0x272   :  { %v335_v55 = vadd.f32 %v477_v50, %v334_v54 }
 0x273   :  { %v573_v56 = vpop.f32.mrf.mxu0 }
 0x274   :  { %v339_v58 = vmax.f32 %v335_v55, 0.0 }
 0x276   :  { %v340_v59 = vpack.c.bf16 %v339_v58, %v338_v57 }
 0x278   :  { %591 = vmatmul.mubr.bf16.vlgmr.msra.gmra.mxu1 %v340_v59 }
 0x338   :  { %v448_v61 = vpop.f32.mrf.mxu1 }
 0x339   :  { %v449_v62 = vadd.f32 %v487_v60, %v448_v61 }
 0x33a   :  { %v592_v63 = vpop.f32.mrf.mxu1 }
 0x33b   :  { %456 = vst.msk [vmem:[%s754_s5] sm:$0xff] %vm455_vm2, %v449_v62 }
 0x33c   :  { %v451_v0 = vpop.f32.mrf.mxu1 }
 0x33d   :  { %v452_v1 = vadd.f32 %v487_v60, %v451_v0 }
 0x33e   :  { %v593_v2 = vpop.f32.mrf.mxu1 }
 0x33f   :  { %457 = vst.msk [vmem:[%s754_s5 + $0x8] sm:$0xff] %vm455_vm2, %v452_v1 }
 0x340   :  { %462 = vsyncpa [#allocation3], 1 }

</bundles_post_ra>
